<compile_context>
chip_gen: v5e
topology: v5e:2x2
jax: 0.10.0
libtpu: 0.0.40
codegen_flags: <defaults>
</compile_context>

<pallas_src>
import jax
import jax.numpy as jnp
from jax.experimental import pallas as pl
from jax.experimental.pallas import tpu as pltpu

LANE = 128
K_THRESHOLD = 0  # self.k = 0 in the PyTorch module

_TARGET_BLOCK_BYTES = 2 * 1024 * 1024  # ~2 MiB per block: good on v5e/v6e/v7x


def _sparse_kernel(x_ref, o_ref):
    x = x_ref[...]
    # torch.where(X < 0, 0, X): scalar 0 (no broadcasted zeros temp).
    o_ref[...] = jnp.where(x < K_THRESHOLD, 0, x)


def _sublane_for(dtype):
    itemsize = jnp.dtype(dtype).itemsize
    if itemsize == 2:   # bf16/f16 pack 2 rows per sublane
        return 16
    if itemsize == 1:   # int8/fp8 pack 4 rows per sublane
        return 32
    return 8


def sparse_forward(x):
    """Elementwise threshold (torch.where(X < 0, 0, X)) as a Pallas TPU kernel."""
    orig_shape = x.shape
    dtype = x.dtype
    n = x.size
    if n == 0:
        return x

    itemsize = jnp.dtype(dtype).itemsize
    sublane = _sublane_for(dtype)

    flat = x.reshape(-1)

    # Widest lane-dense width (multiple of 128) that divides n so no padding
    # or post-slice is ever materialized (common for NCHW / transformer
    # shapes).  Wider width -> fewer, unmasked full-lane stores.
    width = None
    for w in (8192, 4096, 2048, 1024, 512, 256, 128):
        if n % w == 0:
            width = w
            break

    if width is None:
        # Fallback for awkward element counts: pad to one lane multiple.
        width = LANE
        padded_n = ((n + width - 1) // width) * width
        flat = jnp.pad(flat, (0, padded_n - n))
    else:
        padded_n = n

    rows = padded_n // width
    x2d = flat.reshape(rows, width)

    # ~2 MiB block, sublane-aligned row tile; cdiv grid masks the partial
    # last block so the big tile is always used (no degenerate 8-row tiles).
    target_rows = max(
        sublane, (_TARGET_BLOCK_BYTES // (width * itemsize)) // sublane * sublane
    )
    if rows <= target_rows:
        row_tile = rows          # full-extent block (always legal)
    else:
        row_tile = target_rows   # multiple of the dtype's sublane packing
    grid = (pl.cdiv(rows, row_tile),)

    out2d = pl.pallas_call(
        _sparse_kernel,
        out_shape=jax.ShapeDtypeStruct((rows, width), dtype),
        grid_spec=pltpu.PrefetchScalarGridSpec(
            num_scalar_prefetch=0,
            grid=grid,
            in_specs=[pl.BlockSpec((row_tile, width), lambda i: (i, 0))],
            out_specs=pl.BlockSpec((row_tile, width), lambda i: (i, 0)),
        ),
        compiler_params=pltpu.CompilerParams(
            dimension_semantics=("parallel",),
        ),
        cost_estimate=pl.CostEstimate(
            flops=padded_n,
            transcendentals=0,
            bytes_accessed=2 * padded_n * itemsize,
        ),
    )(x2d)

    if padded_n != n:
        out = out2d.reshape(-1)[:n].reshape(orig_shape)
    else:
        out = out2d.reshape(orig_shape)
    return out


if __name__ == "__main__":
    key = jax.random.PRNGKey(0)
    # NCHW input, small shape consistent with an image-like tensor.
    x = jax.random.normal(key, (2, 4, 16, 16), dtype=jnp.float32)

    y = sparse_forward(x)
    y = jax.block_until_ready(y)

    # Reference check against plain-JAX semantics of torch.where(X < 0, 0, X).
    ref = jnp.where(x < K_THRESHOLD, 0.0, x)
    assert y.shape == x.shape and y.dtype == x.dtype
    assert bool(jnp.allclose(y, ref)), "mismatch vs reference"

    print("KERNEL_OK")
</pallas_src>

<mosaic_0001>
module attributes {stable_mosaic.version = 11 : i64} {
  func.func @_sparse_kernel(%arg0: i32, %arg1: memref<1x2048xf32, #tpu.memory_space<vmem>>, %arg2: memref<1x2048xf32, #tpu.memory_space<vmem>>) attributes {dimension_semantics = [#tpu.dimension_semantics<parallel>], iteration_bounds = array<i64: 1>, scalar_prefetch = 0 : i64, scratch_operands = 0 : i64, tpu.core_type = #tpu.core_type<tc>, window_params = [{transform_indices = @transform_0, window_bounds = array<i64: 1, 2048>}, {transform_indices = @transform_1, window_bounds = array<i64: 1, 2048>}]} {
    %c0 = arith.constant 0 : index
    %c0_0 = arith.constant 0 : index
    %0 = vector.load %arg1[%c0, %c0_0] : memref<1x2048xf32, #tpu.memory_space<vmem>>, vector<1x2048xf32>
    %cst = arith.constant 0.000000e+00 : f32
    %1 = vector.broadcast %cst : f32 to vector<1x2048xf32>
    %2 = arith.cmpf olt, %0, %1 : vector<1x2048xf32>
    %c0_i32 = arith.constant 0 : i32
    %3 = arith.sitofp %c0_i32 : i32 to f32
    %4 = vector.broadcast %3 : f32 to vector<1x2048xf32>
    %5 = arith.select %2, %4, %0 : vector<1x2048xi1>, vector<1x2048xf32>
    %c0_1 = arith.constant 0 : index
    %c0_2 = arith.constant 0 : index
    %6 = vector.load %arg2[%c0_1, %c0_2] : memref<1x2048xf32, #tpu.memory_space<vmem>>, vector<1x2048xf32>
    tpu.vector_store %arg2[%c0_1, %c0_2], %5 {strides = array<i32>} : memref<1x2048xf32, #tpu.memory_space<vmem>>, vector<1x2048xf32>,
    return
  }
  func.func @transform_0(%arg0: i32) -> (i32, i32) {
    %c0_i32 = arith.constant 0 : i32
    %c0_i32_0 = arith.constant 0 : i32
    return %arg0, %c0_i32 : i32, i32
  }
  func.func @transform_1(%arg0: i32) -> (i32, i32) {
    %c0_i32 = arith.constant 0 : i32
    %c0_i32_0 = arith.constant 0 : i32
    return %arg0, %c0_i32 : i32, i32
  }
}

</mosaic_0001>

<bundles_post_ra>
// kernel: tpu_custom_call.1
= control target key start
LH: loop header
LB: loop body
LE: loop exit
PB: predicated region body
PF: predicated region fallthrough
CT: control target
= control target key end

     0   :  { %6 = vsyncpa [#allocation3], 0  ;;  %s120_s0 = inlined_call_operand.hbm [shape: f32[1,2048], index: 0, kind: input, shape index: {}]   ;;  %s121_s1 = inlined_call_operand.hbm [shape: f32[1,2048], index: 1, kind: output, shape index: {}]  }
   0x1   :  { %7 = vsyncpa [#allocation4], 0  ;;  %s13_s8 = sshll.u32 %s120_s0, 4  ;;  %s102_s9 = smov [#allocation2]   ;;  %s14_s8 = int_to_ptr.hbm [resolvable:$true] %s13_s8 }
   0x2   :  { %s15_s10 = sshll.u32 %s102_s9, 4  ;;  %s16_s10 = int_to_ptr.vmem [resolvable:$true] %s15_s10 }
   0x3   :  { %18 = dma.hbm_to_vmem [thread:$0]  %s14_s8, 256, %s16_s10, [#allocation3]  }
   0x4   :  { %98 = dma.done.wait [#allocation3], 256  }
   0x5   :  { %99 = vsyncadd [#allocation3], 4294967040  ;;  %s103_s11 = smov [#allocation5]   ;;  %s38_s15 = sshll.u32 %s121_s1, 4  ;;  %v23_v0 = vld [vmem:[#allocation2] sm:$0xff]  ;;  %v24_v1 = vld [vmem:[#allocation2 + $0x8] sm:$0xff]  ;;  %s39_s15 = int_to_ptr.hbm [resolvable:$true] %s38_s15 }
   0x6   :  { %s36_s12 = sshll.u32 %s103_s11, 4  ;;  %vm25_vm0 = vcmp.lt.f32.partialorder %v23_v0, 0.0  ;;  %vm26_vm1 = vcmp.lt.f32.partialorder %v24_v1, 0.0  ;;  %s37_s12 = int_to_ptr.vmem [resolvable:$true] %s36_s12 }
   0x7   :  { %v27_v2 = vsel %vm25_vm0, 0.0, %v23_v0  ;;  %v28_v3 = vsel %vm26_vm1, 0.0, %v24_v1 }
   0x8   :  { %29 = vst [vmem:[#allocation5] sm:$0xff] %v27_v2 }
   0x9   :  { %30 = vst [vmem:[#allocation5 + $0x8] sm:$0xff] %v28_v3 }
   0xa   :  { %41 = dma.vmem_to_hbm [thread:$0]  %s37_s12, 256, %s39_s15, [#allocation4]  }
   0xb   :  { %100 = dma.done.wait [#allocation4], 256  }
   0xc   :  { %101 = vsyncadd [#allocation4], 4294967040 }
   0xd   :  { %46 = vsyncpa [#allocation3], 1 }
   0xe   :  { %47 = vsyncpa [#allocation4], 1 }

</bundles_post_ra>
